<compile_context>
chip_gen: v6e
topology: v6e:2x2x1
jax: 0.10.0
libtpu: 0.0.40
codegen_flags: <defaults>
</compile_context>

<pallas_src>
import jax
import jax.numpy as jnp
from jax.experimental import pallas as pl
from jax.experimental.pallas import tpu as pltpu

# ----------------------------- configuration --------------------------------
B = 8            # batch (bias blocks are pre-broadcast to 8 rows; keep B == 8)
E = 32           # emb_dim
H = 32           # dec_hid_dim
L = 4            # num_layers
V = 64           # output_dim (vocab)
UNK_I = 1        # unk token index
ENC_HID = 16     # enc_hid_dim (unused: attentions=[])

GC = 4 * H       # 128 fused gate columns: [r | z | i_n | h_n]

# ---- slab row offsets (slab width is always GC = 128 lanes, f32) ----
OFF_WHH = 0                      # rows [  0,128): Wh_l (H,4H) per layer, cols [r|z|0|n]
OFF_WX = L * H                   # rows [128,224): Wx_l (H,4H) for layers 1..3, cols [r|z|n|0]
OFF_TG0 = OFF_WX + (L - 1) * H   # rows [224,288): Emb @ Wx_0 + bias_0   (V,4H)
OFF_B = OFF_TG0 + V              # rows [288,312): biases layers 1..3, broadcast to 8 rows each
OFF_WOH = OFF_B + (L - 1) * 8    # rows [312,344): out-Linear hidden part (H,V) in lanes 0:V
OFF_TOUT = OFF_WOH + H           # rows [344,408): Emb @ W_e + b_out      (V,V) in lanes 0:V
ROWS = OFF_TOUT + V              # 408 rows total (multiple of 8) -> ~204 KiB f32


# ------------------------------- Pallas kernel -------------------------------
def _decoder_kernel(tok_ref, h0_ref, slab_ref, logits_ref, hout_ref, h_sc):
    """One grid step == one Decoder.forward step; hidden carried in h_sc."""
    t = pl.program_id(0)

    @pl.when(t == 0)
    def _init():
        h_sc[...] = h0_ref[...]                               # (L, B, H)

    # ---- token -> one-hot (torch.where(input < output_dim, input, unk)) ----
    tok = tok_ref[...]                                        # (B, 1) int32
    # Also map negative ids to UNK (PyTorch would error; keeps the one-hot valid).
    tok = jnp.where((tok >= 0) & (tok < V), tok, jnp.full_like(tok, UNK_I))
    onehot = (jax.lax.broadcasted_iota(jnp.int32, (B, V), 1) == tok)
    onehot = onehot.astype(jnp.float32)                       # (B, V)

    # ---- layer-0 input term: onehot @ (Emb @ Wx0 + bias0) == Emb[tok]@Wx0+b0
    x_contrib = jnp.dot(onehot, slab_ref[OFF_TG0:OFF_TG0 + V, :],
                        preferred_element_type=jnp.float32)   # (B, 4H)

    # ---- L-layer GRU, single time step (static unroll) ----------------------
    x = None
    for l in range(L):
        h_old = h_sc[l]                                       # (B, H) tile load
        wh = slab_ref[OFF_WHH + H * l:OFF_WHH + H * (l + 1), :]     # (H, 4H)
        g = x_contrib + jnp.dot(h_old, wh, preferred_element_type=jnp.float32)
        if l > 0:
            g = g + slab_ref[OFF_B + 8 * (l - 1):OFF_B + 8 * l, :]  # (8, 128)

        rz = jax.nn.sigmoid(g[:, 0:2 * H])                    # one EUP batch (B, 2H)
        r = rz[:, 0:H]
        z = rz[:, H:2 * H]
        n = jnp.tanh(g[:, 2 * H:3 * H] + r * g[:, 3 * H:4 * H])
        x = n + z * (h_old - n)                               # == (1-z)*n + z*h_old
        h_sc[l] = x                                           # (B, H) tile store

        if l + 1 < L:                                         # input term of next layer
            wx = slab_ref[OFF_WX + H * l:OFF_WX + H * (l + 1), :]   # Wx_{l+1} (H, 4H)
            x_contrib = jnp.dot(x, wx, preferred_element_type=jnp.float32)

    # ---- output projection: logits = h_top @ W_oh + Emb[tok] @ W_e + b_out --
    w_oh = slab_ref[OFF_WOH:OFF_WOH + H, 0:V]                 # (H, V)
    t_out = slab_ref[OFF_TOUT:OFF_TOUT + V, 0:V]              # (V, V), bias folded in
    logits_ref[...] = (jnp.dot(x, w_oh, preferred_element_type=jnp.float32)
                       + jnp.dot(onehot, t_out, preferred_element_type=jnp.float32))

    @pl.when(t == pl.num_programs(0) - 1)
    def _finalize():
        hout_ref[...] = h_sc[...]                             # (L, B, H)


# ------------------------------- wrappers -------------------------------------
@jax.jit
def decoder_forward_seq(tokens_tb, hidden, encoder_agenda, slab):
    """T chained Decoder.forward steps (teacher-forced tokens) in one pallas_call."""
    T = tokens_tb.shape[0]
    if hidden is None:
        # get_initial_hidden (GRU): encoder_agenda repeated for every layer.
        h0 = jnp.broadcast_to(encoder_agenda.astype(jnp.float32)[None, :, :], (L, B, H))
    else:
        h0 = hidden.astype(jnp.float32)
    tok3 = tokens_tb.astype(jnp.int32).reshape(T, B, 1)

    grid_spec = pltpu.PrefetchScalarGridSpec(
        num_scalar_prefetch=0,
        grid=(T,),
        in_specs=[
            # per-step token block, pipelined ahead of compute
            pl.BlockSpec((None, B, 1), lambda t: (t, 0, 0)),
            # initial hidden: fetched once (constant index_map)
            pl.BlockSpec((L, B, H), lambda t: (0, 0, 0)),
            # weight slab: fetched once, VMEM-resident for all T steps
            pl.BlockSpec((ROWS, GC), lambda t: (0, 0)),
        ],
        out_specs=(
            # per-step logits block
            pl.BlockSpec((None, B, V), lambda t: (t, 0, 0)),
            # final hidden: resident, written back once at grid end
            pl.BlockSpec((L, B, H), lambda t: (0, 0, 0)),
        ),
        scratch_shapes=[pltpu.VMEM((L, B, H), jnp.float32)],   # hidden carry
    )

    logits, h_new = pl.pallas_call(
        _decoder_kernel,
        out_shape=(
            jax.ShapeDtypeStruct((T, B, V), jnp.float32),
            jax.ShapeDtypeStruct((L, B, H), jnp.float32),
        ),
        grid_spec=grid_spec,
        input_output_aliases={1: 1},   # hidden state updated in place in HBM
        compiler_params=pltpu.CompilerParams(dimension_semantics=("arbitrary",)),
    )(tok3, h0, slab)
    return logits, h_new


def decoder_forward(tokens, hidden, encoder_agenda, slab):
    """Exact mirror of Decoder.forward (attentions=[], GRU, eval-mode dropout)."""
    logits, h_new = decoder_forward_seq(tokens.reshape(1, B), hidden,
                                        encoder_agenda, slab)
    return logits[0], h_new


# ----------------------------- weight packing ---------------------------------
def pack_params(raw):
    """Pack PyTorch-layout GRU/Linear/embedding weights into one (408,128) slab."""
    P = jax.lax.Precision.HIGHEST
    slab = jnp.zeros((ROWS, GC), jnp.float32)

    def gate_cols_x(w_ih):          # (3H, in_dim) -> (in_dim, 4H): [r | z | n | 0]
        in_dim = w_ih.shape[1]
        m = jnp.zeros((in_dim, GC), jnp.float32)
        m = m.at[:, 0:2 * H].set(w_ih[0:2 * H].T)
        m = m.at[:, 2 * H:3 * H].set(w_ih[2 * H:3 * H].T)
        return m

    def gate_cols_h(w_hh):          # (3H, H) -> (H, 4H): [r | z | 0 | n]
        m = jnp.zeros((H, GC), jnp.float32)
        m = m.at[:, 0:2 * H].set(w_hh[0:2 * H].T)
        m = m.at[:, 3 * H:4 * H].set(w_hh[2 * H:3 * H].T)
        return m

    def packed_bias(b_ih, b_hh):    # [b_ih_r+b_hh_r | b_ih_z+b_hh_z | b_ih_n | b_hh_n]
        return jnp.concatenate([b_ih[0:2 * H] + b_hh[0:2 * H],
                                b_ih[2 * H:3 * H],
                                b_hh[2 * H:3 * H]])

    # recurrent (h-side) weights, all layers
    for l in range(L):
        slab = slab.at[OFF_WHH + H * l:OFF_WHH + H * (l + 1), :].set(
            gate_cols_h(raw[f"w_hh_{l}"]))
    # input (x-side) weights, layers 1..3
    for l in range(1, L):
        slab = slab.at[OFF_WX + H * (l - 1):OFF_WX + H * l, :].set(
            gate_cols_x(raw[f"w_ih_{l}"]))
    # layer-0 x-side folded with the embedding table + layer-0 packed bias
    tg0 = (jnp.dot(raw["embedding"], gate_cols_x(raw["w_ih_0"]), precision=P)
           + packed_bias(raw["b_ih_0"], raw["b_hh_0"])[None, :])
    slab = slab.at[OFF_TG0:OFF_TG0 + V, :].set(tg0)
    # biases layers 1..3, pre-broadcast over the 8 batch rows (full-vreg add)
    for l in range(1, L):
        pb = packed_bias(raw[f"b_ih_{l}"], raw[f"b_hh_{l}"])
        slab = slab.at[OFF_B + 8 * (l - 1):OFF_B + 8 * l, :].set(
            jnp.broadcast_to(pb[None, :], (8, GC)))
    # out Linear: input feature order is [hidden | emb]; weight shape (V, H+E)
    w_out, b_out = raw["w_out"], raw["b_out"]
    slab = slab.at[OFF_WOH:OFF_WOH + H, 0:V].set(w_out[:, 0:H].T)
    t_out = (jnp.dot(raw["embedding"], w_out[:, H:H + E].T, precision=P)
             + b_out[None, :])
    slab = slab.at[OFF_TOUT:OFF_TOUT + V, 0:V].set(t_out)
    return slab


# --------------------------- pure-JAX reference -------------------------------
def _hdot(a, b):
    return jnp.dot(a, b, precision=jax.lax.Precision.HIGHEST)


def decoder_reference(tokens, hidden, encoder_agenda, raw):
    if hidden is None:
        hidden = jnp.broadcast_to(encoder_agenda[None, :, :], (L, B, H))
    tok = jnp.where(tokens < V, tokens, jnp.full_like(tokens, UNK_I))
    emb = raw["embedding"][tok]                                   # (B, E)

    x = emb
    hs = []
    for l in range(L):
        w_ih, w_hh = raw[f"w_ih_{l}"], raw[f"w_hh_{l}"]
        b_ih, b_hh = raw[f"b_ih_{l}"], raw[f"b_hh_{l}"]
        gi = _hdot(x, w_ih.T) + b_ih
        gh = _hdot(hidden[l], w_hh.T) + b_hh
        r = jax.nn.sigmoid(gi[:, :H] + gh[:, :H])
        z = jax.nn.sigmoid(gi[:, H:2 * H] + gh[:, H:2 * H])
        n = jnp.tanh(gi[:, 2 * H:] + r * gh[:, 2 * H:])
        x = (1.0 - z) * n + z * hidden[l]
        hs.append(x)
    feat = jnp.concatenate([x, emb], axis=1)
    logits = _hdot(feat, raw["w_out"].T) + raw["b_out"]
    return logits, jnp.stack(hs, axis=0)


def decoder_reference_seq(tokens_tb, hidden, encoder_agenda, raw):
    logits = []
    h = hidden
    for t in range(tokens_tb.shape[0]):
        lg, h = decoder_reference(tokens_tb[t], h, encoder_agenda, raw)
        logits.append(lg)
    return jnp.stack(logits, axis=0), h


# ------------------------------ param init ------------------------------------
def init_raw_params(key):
    def u(k, shape, scale=0.1):
        return jax.random.uniform(k, shape, jnp.float32, -scale, scale)

    ks = jax.random.split(key, 4 * L + 5)
    raw = {}
    ki = 0
    for l in range(L):
        in_dim = E if l == 0 else H
        raw[f"w_ih_{l}"] = u(ks[ki], (3 * H, in_dim)); ki += 1
        raw[f"w_hh_{l}"] = u(ks[ki], (3 * H, H)); ki += 1
        raw[f"b_ih_{l}"] = u(ks[ki], (3 * H,)); ki += 1
        raw[f"b_hh_{l}"] = u(ks[ki], (3 * H,)); ki += 1
    raw["w_out"] = u(ks[ki], (V, H + E)); ki += 1
    raw["b_out"] = u(ks[ki], (V,)); ki += 1
    raw["embedding"] = u(ks[ki], (V, E)); ki += 1
    # present in the PyTorch module but unused on the GRU forward path
    raw["rnn_init_hidden"] = u(ks[ki], (L, H)); ki += 1
    raw["rnn_init_cell"] = u(ks[ki], (L, H)); ki += 1
    return raw


# --------------------------------- main ---------------------------------------
if __name__ == "__main__":
    key = jax.random.PRNGKey(0)
    kp, kt, ka, kt2 = jax.random.split(key, 4)

    raw = init_raw_params(kp)
    slab = pack_params(raw)                      # one-time weight packing

    T = 6
    # token ids, some >= output_dim to exercise the unk clamp
    tokens = jax.random.randint(kt, (T, B), 0, V + 10, dtype=jnp.int32)
    encoder_agenda = jax.random.uniform(ka, (B, H), jnp.float32, -1.0, 1.0)

    # ---- multi-step decode (grid over T), hidden=None -> get_initial_hidden ----
    logits_seq, h_seq = decoder_forward_seq(tokens, None, encoder_agenda, slab)
    jax.block_until_ready((logits_seq, h_seq))

    ref_logits_seq, ref_h_seq = decoder_reference_seq(tokens, None, encoder_agenda, raw)
    assert logits_seq.shape == (T, B, V) and h_seq.shape == (L, B, H)
    assert jnp.allclose(logits_seq, ref_logits_seq, atol=2e-3, rtol=2e-3), \
        float(jnp.max(jnp.abs(logits_seq - ref_logits_seq)))
    assert jnp.allclose(h_seq, ref_h_seq, atol=2e-3, rtol=2e-3), \
        float(jnp.max(jnp.abs(h_seq - ref_h_seq)))

    # ---- single-step path (module forward), continuing from the carried hidden ----
    tok1 = jax.random.randint(kt2, (B,), 0, V + 10, dtype=jnp.int32)
    logits1, h1 = decoder_forward(tok1, h_seq, encoder_agenda, slab)
    jax.block_until_ready((logits1, h1))

    ref_logits1, ref_h1 = decoder_reference(tok1, ref_h_seq, encoder_agenda, raw)
    assert logits1.shape == (B, V) and h1.shape == (L, B, H)
    assert jnp.allclose(logits1, ref_logits1, atol=2e-3, rtol=2e-3), \
        float(jnp.max(jnp.abs(logits1 - ref_logits1)))
    assert jnp.allclose(h1, ref_h1, atol=2e-3, rtol=2e-3), \
        float(jnp.max(jnp.abs(h1 - ref_h1)))

    print("KERNEL_OK")
</pallas_src>

<mosaic_0001>
module attributes {stable_mosaic.version = 11 : i64} {
  func.func @_decoder_kernel(%arg0: i32, %arg1: memref<1x8x1xi32, #tpu.memory_space<vmem>>, %arg2: memref<4x8x32xf32, #tpu.memory_space<vmem>>, %arg3: memref<408x128xf32, #tpu.memory_space<vmem>>, %arg4: memref<1x8x64xf32, #tpu.memory_space<vmem>>, %arg5: memref<4x8x32xf32, #tpu.memory_space<vmem>>, %arg6: memref<4x8x32xf32, #tpu.memory_space<vmem>>) attributes {dimension_semantics = [#tpu.dimension_semantics<arbitrary>], iteration_bounds = array<i64: 6>, scalar_prefetch = 0 : i64, scratch_operands = 1 : i64, tpu.core_type = #tpu.core_type<tc>, window_params = [{transform_indices = @transform_0, window_bounds = array<i64: 1, 8, 1>}, {pipeline_mode = #tpu.pipeline_mode<synchronous>, transform_indices = @transform_1, window_bounds = array<i64: 4, 8, 32>}, {pipeline_mode = #tpu.pipeline_mode<synchronous>, transform_indices = @transform_2, window_bounds = array<i64: 408, 128>}, {transform_indices = @transform_3, window_bounds = array<i64: 1, 8, 64>}, {pipeline_mode = #tpu.pipeline_mode<synchronous>, transform_indices = @transform_4, window_bounds = array<i64: 4, 8, 32>}]} {
    %c0_i32 = arith.constant 0 : i32
    %0 = arith.cmpi eq, %arg0, %c0_i32 : i32
    %1 = arith.extui %0 : i1 to i32
    %c0_i32_0 = arith.constant 0 : i32
    %2 = arith.cmpi ne, %1, %c0_i32_0 : i32
    scf.if %2 {
      %c0_56 = arith.constant 0 : index
      %c0_57 = arith.constant 0 : index
      %c0_58 = arith.constant 0 : index
      %138 = vector.load %arg2[%c0_56, %c0_57, %c0_58] : memref<4x8x32xf32, #tpu.memory_space<vmem>>, vector<4x8x32xf32>
      %c0_59 = arith.constant 0 : index
      %c0_60 = arith.constant 0 : index
      %c0_61 = arith.constant 0 : index
      %139 = vector.load %arg6[%c0_59, %c0_60, %c0_61] : memref<4x8x32xf32, #tpu.memory_space<vmem>>, vector<4x8x32xf32>
      tpu.vector_store %arg6[%c0_59, %c0_60, %c0_61], %138 {strides = array<i32>} : memref<4x8x32xf32, #tpu.memory_space<vmem>>, vector<4x8x32xf32>,
    } else {
    }
    %c0 = arith.constant 0 : index
    %c0_1 = arith.constant 0 : index
    %c0_2 = arith.constant 0 : index
    %3 = vector.load %arg1[%c0, %c0_1, %c0_2] : memref<1x8x1xi32, #tpu.memory_space<vmem>>, vector<1x8x1xi32>
    %4 = vector.shape_cast %3 : vector<1x8x1xi32> to vector<8x1xi32>
    %c0_i32_3 = arith.constant 0 : i32
    %5 = vector.broadcast %c0_i32_3 : i32 to vector<8x1xi32>
    %6 = arith.cmpi sge, %4, %5 : vector<8x1xi32>
    %c64_i32 = arith.constant 64 : i32
    %7 = vector.broadcast %c64_i32 : i32 to vector<8x1xi32>
    %8 = arith.cmpi slt, %4, %7 : vector<8x1xi32>
    %9 = arith.andi %6, %8 : vector<8x1xi1>
    %c1_i32 = arith.constant 1 : i32
    %10 = vector.broadcast %c1_i32 : i32 to vector<8x1xi32>
    %11 = arith.select %9, %4, %10 : vector<8x1xi1>, vector<8x1xi32>
    %12 = tpu.iota {dimensions = array<i32: 1>} : vector<8x64xi32>
    %13 = vector.broadcast %11 : vector<8x1xi32> to vector<8x64xi32>
    %14 = arith.cmpi eq, %12, %13 : vector<8x64xi32>
    %15 = arith.extui %14 : vector<8x64xi1> to vector<8x64xi32>
    %16 = arith.sitofp %15 : vector<8x64xi32> to vector<8x64xf32>
    %c224 = arith.constant 224 : index
    %c0_4 = arith.constant 0 : index
    %17 = vector.load %arg3[%c224, %c0_4] : memref<408x128xf32, #tpu.memory_space<vmem>>, vector<64x128xf32>
    %cst = arith.constant dense<0.000000e+00> : vector<8x128xf32>
    %18 = tpu.matmul %16, %17, %cst {dimension_numbers = #tpu.dot_dimension_numbers<[1], [0], [0], [1], [0, 0, 1, 1], [], []>} : vector<8x64xf32>, vector<64x128xf32>, vector<8x128xf32> -> vector<8x128xf32>
    %c0_5 = arith.constant 0 : index
    %c0_6 = arith.constant 0 : index
    %c0_7 = arith.constant 0 : index
    %19 = vector.load %arg6[%c0_5, %c0_6, %c0_7] : memref<4x8x32xf32, #tpu.memory_space<vmem>>, vector<1x8x32xf32>
    %20 = vector.shape_cast %19 : vector<1x8x32xf32> to vector<8x32xf32>
    %c0_8 = arith.constant 0 : index
    %c0_9 = arith.constant 0 : index
    %21 = vector.load %arg3[%c0_8, %c0_9] : memref<408x128xf32, #tpu.memory_space<vmem>>, vector<32x128xf32>
    %cst_10 = arith.constant dense<0.000000e+00> : vector<8x128xf32>
    %22 = tpu.matmul %20, %21, %cst_10 {dimension_numbers = #tpu.dot_dimension_numbers<[1], [0], [0], [1], [0, 0, 1, 1], [], []>} : vector<8x32xf32>, vector<32x128xf32>, vector<8x128xf32> -> vector<8x128xf32>
    %23 = arith.addf %18, %22 : vector<8x128xf32>
    %24 = vector.extract_strided_slice %23 {offsets = [0, 0], sizes = [8, 64], strides = [1, 1]} : vector<8x128xf32> to vector<8x64xf32>
    %25 = arith.negf %24 : vector<8x64xf32>
    %26 = math.exp %25 : vector<8x64xf32>
    %cst_11 = arith.constant 1.000000e+00 : f32
    %27 = vector.broadcast %cst_11 : f32 to vector<8x64xf32>
    %28 = arith.addf %27, %26 : vector<8x64xf32>
    %29 = arith.divf %27, %28 : vector<8x64xf32>
    %30 = vector.extract_strided_slice %29 {offsets = [0, 0], sizes = [8, 32], strides = [1, 1]} : vector<8x64xf32> to vector<8x32xf32>
    %31 = vector.extract_strided_slice %29 {offsets = [0, 32], sizes = [8, 32], strides = [1, 1]} : vector<8x64xf32> to vector<8x32xf32>
    %32 = vector.extract_strided_slice %23 {offsets = [0, 64], sizes = [8, 32], strides = [1, 1]} : vector<8x128xf32> to vector<8x32xf32>
    %33 = vector.extract_strided_slice %23 {offsets = [0, 96], sizes = [8, 32], strides = [1, 1]} : vector<8x128xf32> to vector<8x32xf32>
    %34 = arith.mulf %30, %33 : vector<8x32xf32>
    %35 = arith.addf %32, %34 : vector<8x32xf32>
    %36 = math.tanh %35 : vector<8x32xf32>
    %37 = arith.subf %20, %36 : vector<8x32xf32>
    %38 = arith.mulf %31, %37 : vector<8x32xf32>
    %39 = arith.addf %36, %38 : vector<8x32xf32>
    %c0_12 = arith.constant 0 : index
    %c0_13 = arith.constant 0 : index
    %c0_14 = arith.constant 0 : index
    %40 = vector.load %arg6[%c0_12, %c0_13, %c0_14] : memref<4x8x32xf32, #tpu.memory_space<vmem>>, vector<1x8x32xf32>
    %41 = vector.shape_cast %40 : vector<1x8x32xf32> to vector<8x32xf32>
    %42 = vector.shape_cast %39 : vector<8x32xf32> to vector<1x8x32xf32>
    tpu.vector_store %arg6[%c0_12, %c0_13, %c0_14], %42 {strides = array<i32>} : memref<4x8x32xf32, #tpu.memory_space<vmem>>, vector<1x8x32xf32>,
    %c128 = arith.constant 128 : index
    %c0_15 = arith.constant 0 : index
    %43 = vector.load %arg3[%c128, %c0_15] : memref<408x128xf32, #tpu.memory_space<vmem>>, vector<32x128xf32>
    %cst_16 = arith.constant dense<0.000000e+00> : vector<8x128xf32>
    %44 = tpu.matmul %39, %43, %cst_16 {dimension_numbers = #tpu.dot_dimension_numbers<[1], [0], [0], [1], [0, 0, 1, 1], [], []>} : vector<8x32xf32>, vector<32x128xf32>, vector<8x128xf32> -> vector<8x128xf32>
    %c1 = arith.constant 1 : index
    %c0_17 = arith.constant 0 : index
    %c0_18 = arith.constant 0 : index
    %45 = vector.load %arg6[%c1, %c0_17, %c0_18] : memref<4x8x32xf32, #tpu.memory_space<vmem>>, vector<1x8x32xf32>
    %46 = vector.shape_cast %45 : vector<1x8x32xf32> to vector<8x32xf32>
    %c32 = arith.constant 32 : index
    %c0_19 = arith.constant 0 : index
    %47 = vector.load %arg3[%c32, %c0_19] : memref<408x128xf32, #tpu.memory_space<vmem>>, vector<32x128xf32>
    %cst_20 = arith.constant dense<0.000000e+00> : vector<8x128xf32>
    %48 = tpu.matmul %46, %47, %cst_20 {dimension_numbers = #tpu.dot_dimension_numbers<[1], [0], [0], [1], [0, 0, 1, 1], [], []>} : vector<8x32xf32>, vector<32x128xf32>, vector<8x128xf32> -> vector<8x128xf32>
    %49 = arith.addf %44, %48 : vector<8x128xf32>
    %c288 = arith.constant 288 : index
    %c0_21 = arith.constant 0 : index
    %50 = vector.load %arg3[%c288, %c0_21] : memref<408x128xf32, #tpu.memory_space<vmem>>, vector<8x128xf32>
    %51 = arith.addf %49, %50 : vector<8x128xf32>
    %52 = vector.extract_strided_slice %51 {offsets = [0, 0], sizes = [8, 64], strides = [1, 1]} : vector<8x128xf32> to vector<8x64xf32>
    %53 = arith.negf %52 : vector<8x64xf32>
    %54 = math.exp %53 : vector<8x64xf32>
    %cst_22 = arith.constant 1.000000e+00 : f32
    %55 = vector.broadcast %cst_22 : f32 to vector<8x64xf32>
    %56 = arith.addf %55, %54 : vector<8x64xf32>
    %57 = arith.divf %55, %56 : vector<8x64xf32>
    %58 = vector.extract_strided_slice %57 {offsets = [0, 0], sizes = [8, 32], strides = [1, 1]} : vector<8x64xf32> to vector<8x32xf32>
    %59 = vector.extract_strided_slice %57 {offsets = [0, 32], sizes = [8, 32], strides = [1, 1]} : vector<8x64xf32> to vector<8x32xf32>
    %60 = vector.extract_strided_slice %51 {offsets = [0, 64], sizes = [8, 32], strides = [1, 1]} : vector<8x128xf32> to vector<8x32xf32>
    %61 = vector.extract_strided_slice %51 {offsets = [0, 96], sizes = [8, 32], strides = [1, 1]} : vector<8x128xf32> to vector<8x32xf32>
    %62 = arith.mulf %58, %61 : vector<8x32xf32>
    %63 = arith.addf %60, %62 : vector<8x32xf32>
    %64 = math.tanh %63 : vector<8x32xf32>
    %65 = arith.subf %46, %64 : vector<8x32xf32>
    %66 = arith.mulf %59, %65 : vector<8x32xf32>
    %67 = arith.addf %64, %66 : vector<8x32xf32>
    %c1_23 = arith.constant 1 : index
    %c0_24 = arith.constant 0 : index
    %c0_25 = arith.constant 0 : index
    %68 = vector.load %arg6[%c1_23, %c0_24, %c0_25] : memref<4x8x32xf32, #tpu.memory_space<vmem>>, vector<1x8x32xf32>
    %69 = vector.shape_cast %68 : vector<1x8x32xf32> to vector<8x32xf32>
    %70 = vector.shape_cast %67 : vector<8x32xf32> to vector<1x8x32xf32>
    tpu.vector_store %arg6[%c1_23, %c0_24, %c0_25], %70 {strides = array<i32>} : memref<4x8x32xf32, #tpu.memory_space<vmem>>, vector<1x8x32xf32>,
    %c160 = arith.constant 160 : index
    %c0_26 = arith.constant 0 : index
    %71 = vector.load %arg3[%c160, %c0_26] : memref<408x128xf32, #tpu.memory_space<vmem>>, vector<32x128xf32>
    %cst_27 = arith.constant dense<0.000000e+00> : vector<8x128xf32>
    %72 = tpu.matmul %67, %71, %cst_27 {dimension_numbers = #tpu.dot_dimension_numbers<[1], [0], [0], [1], [0, 0, 1, 1], [], []>} : vector<8x32xf32>, vector<32x128xf32>, vector<8x128xf32> -> vector<8x128xf32>
    %c2 = arith.constant 2 : index
    %c0_28 = arith.constant 0 : index
    %c0_29 = arith.constant 0 : index
    %73 = vector.load %arg6[%c2, %c0_28, %c0_29] : memref<4x8x32xf32, #tpu.memory_space<vmem>>, vector<1x8x32xf32>
    %74 = vector.shape_cast %73 : vector<1x8x32xf32> to vector<8x32xf32>
    %c64 = arith.constant 64 : index
    %c0_30 = arith.constant 0 : index
    %75 = vector.load %arg3[%c64, %c0_30] : memref<408x128xf32, #tpu.memory_space<vmem>>, vector<32x128xf32>
    %cst_31 = arith.constant dense<0.000000e+00> : vector<8x128xf32>
    %76 = tpu.matmul %74, %75, %cst_31 {dimension_numbers = #tpu.dot_dimension_numbers<[1], [0], [0], [1], [0, 0, 1, 1], [], []>} : vector<8x32xf32>, vector<32x128xf32>, vector<8x128xf32> -> vector<8x128xf32>
    %77 = arith.addf %72, %76 : vector<8x128xf32>
    %c296 = arith.constant 296 : index
    %c0_32 = arith.constant 0 : index
    %78 = vector.load %arg3[%c296, %c0_32] : memref<408x128xf32, #tpu.memory_space<vmem>>, vector<8x128xf32>
    %79 = arith.addf %77, %78 : vector<8x128xf32>
    %80 = vector.extract_strided_slice %79 {offsets = [0, 0], sizes = [8, 64], strides = [1, 1]} : vector<8x128xf32> to vector<8x64xf32>
    %81 = arith.negf %80 : vector<8x64xf32>
    %82 = math.exp %81 : vector<8x64xf32>
    %cst_33 = arith.constant 1.000000e+00 : f32
    %83 = vector.broadcast %cst_33 : f32 to vector<8x64xf32>
    %84 = arith.addf %83, %82 : vector<8x64xf32>
    %85 = arith.divf %83, %84 : vector<8x64xf32>
    %86 = vector.extract_strided_slice %85 {offsets = [0, 0], sizes = [8, 32], strides = [1, 1]} : vector<8x64xf32> to vector<8x32xf32>
    %87 = vector.extract_strided_slice %85 {offsets = [0, 32], sizes = [8, 32], strides = [1, 1]} : vector<8x64xf32> to vector<8x32xf32>
    %88 = vector.extract_strided_slice %79 {offsets = [0, 64], sizes = [8, 32], strides = [1, 1]} : vector<8x128xf32> to vector<8x32xf32>
    %89 = vector.extract_strided_slice %79 {offsets = [0, 96], sizes = [8, 32], strides = [1, 1]} : vector<8x128xf32> to vector<8x32xf32>
    %90 = arith.mulf %86, %89 : vector<8x32xf32>
    %91 = arith.addf %88, %90 : vector<8x32xf32>
    %92 = math.tanh %91 : vector<8x32xf32>
    %93 = arith.subf %74, %92 : vector<8x32xf32>
    %94 = arith.mulf %87, %93 : vector<8x32xf32>
    %95 = arith.addf %92, %94 : vector<8x32xf32>
    %c2_34 = arith.constant 2 : index
    %c0_35 = arith.constant 0 : index
    %c0_36 = arith.constant 0 : index
    %96 = vector.load %arg6[%c2_34, %c0_35, %c0_36] : memref<4x8x32xf32, #tpu.memory_space<vmem>>, vector<1x8x32xf32>
    %97 = vector.shape_cast %96 : vector<1x8x32xf32> to vector<8x32xf32>
    %98 = vector.shape_cast %95 : vector<8x32xf32> to vector<1x8x32xf32>
    tpu.vector_store %arg6[%c2_34, %c0_35, %c0_36], %98 {strides = array<i32>} : memref<4x8x32xf32, #tpu.memory_space<vmem>>, vector<1x8x32xf32>,
    %c192 = arith.constant 192 : index
    %c0_37 = arith.constant 0 : index
    %99 = vector.load %arg3[%c192, %c0_37] : memref<408x128xf32, #tpu.memory_space<vmem>>, vector<32x128xf32>
    %cst_38 = arith.constant dense<0.000000e+00> : vector<8x128xf32>
    %100 = tpu.matmul %95, %99, %cst_38 {dimension_numbers = #tpu.dot_dimension_numbers<[1], [0], [0], [1], [0, 0, 1, 1], [], []>} : vector<8x32xf32>, vector<32x128xf32>, vector<8x128xf32> -> vector<8x128xf32>
    %c3 = arith.constant 3 : index
    %c0_39 = arith.constant 0 : index
    %c0_40 = arith.constant 0 : index
    %101 = vector.load %arg6[%c3, %c0_39, %c0_40] : memref<4x8x32xf32, #tpu.memory_space<vmem>>, vector<1x8x32xf32>
    %102 = vector.shape_cast %101 : vector<1x8x32xf32> to vector<8x32xf32>
    %c96 = arith.constant 96 : index
    %c0_41 = arith.constant 0 : index
    %103 = vector.load %arg3[%c96, %c0_41] : memref<408x128xf32, #tpu.memory_space<vmem>>, vector<32x128xf32>
    %cst_42 = arith.constant dense<0.000000e+00> : vector<8x128xf32>
    %104 = tpu.matmul %102, %103, %cst_42 {dimension_numbers = #tpu.dot_dimension_numbers<[1], [0], [0], [1], [0, 0, 1, 1], [], []>} : vector<8x32xf32>, vector<32x128xf32>, vector<8x128xf32> -> vector<8x128xf32>
    %105 = arith.addf %100, %104 : vector<8x128xf32>
    %c304 = arith.constant 304 : index
    %c0_43 = arith.constant 0 : index
    %106 = vector.load %arg3[%c304, %c0_43] : memref<408x128xf32, #tpu.memory_space<vmem>>, vector<8x128xf32>
    %107 = arith.addf %105, %106 : vector<8x128xf32>
    %108 = vector.extract_strided_slice %107 {offsets = [0, 0], sizes = [8, 64], strides = [1, 1]} : vector<8x128xf32> to vector<8x64xf32>
    %109 = arith.negf %108 : vector<8x64xf32>
    %110 = math.exp %109 : vector<8x64xf32>
    %cst_44 = arith.constant 1.000000e+00 : f32
    %111 = vector.broadcast %cst_44 : f32 to vector<8x64xf32>
    %112 = arith.addf %111, %110 : vector<8x64xf32>
    %113 = arith.divf %111, %112 : vector<8x64xf32>
    %114 = vector.extract_strided_slice %113 {offsets = [0, 0], sizes = [8, 32], strides = [1, 1]} : vector<8x64xf32> to vector<8x32xf32>
    %115 = vector.extract_strided_slice %113 {offsets = [0, 32], sizes = [8, 32], strides = [1, 1]} : vector<8x64xf32> to vector<8x32xf32>
    %116 = vector.extract_strided_slice %107 {offsets = [0, 64], sizes = [8, 32], strides = [1, 1]} : vector<8x128xf32> to vector<8x32xf32>
    %117 = vector.extract_strided_slice %107 {offsets = [0, 96], sizes = [8, 32], strides = [1, 1]} : vector<8x128xf32> to vector<8x32xf32>
    %118 = arith.mulf %114, %117 : vector<8x32xf32>
    %119 = arith.addf %116, %118 : vector<8x32xf32>
    %120 = math.tanh %119 : vector<8x32xf32>
    %121 = arith.subf %102, %120 : vector<8x32xf32>
    %122 = arith.mulf %115, %121 : vector<8x32xf32>
    %123 = arith.addf %120, %122 : vector<8x32xf32>
    %c3_45 = arith.constant 3 : index
    %c0_46 = arith.constant 0 : index
    %c0_47 = arith.constant 0 : index
    %124 = vector.load %arg6[%c3_45, %c0_46, %c0_47] : memref<4x8x32xf32, #tpu.memory_space<vmem>>, vector<1x8x32xf32>
    %125 = vector.shape_cast %124 : vector<1x8x32xf32> to vector<8x32xf32>
    %126 = vector.shape_cast %123 : vector<8x32xf32> to vector<1x8x32xf32>
    tpu.vector_store %arg6[%c3_45, %c0_46, %c0_47], %126 {strides = array<i32>} : memref<4x8x32xf32, #tpu.memory_space<vmem>>, vector<1x8x32xf32>,
    %c312 = arith.constant 312 : index
    %c0_48 = arith.constant 0 : index
    %127 = vector.load %arg3[%c312, %c0_48] : memref<408x128xf32, #tpu.memory_space<vmem>>, vector<32x64xf32>
    %c344 = arith.constant 344 : index
    %c0_49 = arith.constant 0 : index
    %128 = vector.load %arg3[%c344, %c0_49] : memref<408x128xf32, #tpu.memory_space<vmem>>, vector<64x64xf32>
    %cst_50 = arith.constant dense<0.000000e+00> : vector<8x64xf32>
    %129 = tpu.matmul %123, %127, %cst_50 {dimension_numbers = #tpu.dot_dimension_numbers<[1], [0], [0], [1], [0, 0, 1, 1], [], []>} : vector<8x32xf32>, vector<32x64xf32>, vector<8x64xf32> -> vector<8x64xf32>
    %cst_51 = arith.constant dense<0.000000e+00> : vector<8x64xf32>
    %130 = tpu.matmul %16, %128, %cst_51 {dimension_numbers = #tpu.dot_dimension_numbers<[1], [0], [0], [1], [0, 0, 1, 1], [], []>} : vector<8x64xf32>, vector<64x64xf32>, vector<8x64xf32> -> vector<8x64xf32>
    %131 = arith.addf %129, %130 : vector<8x64xf32>
    %c0_52 = arith.constant 0 : index
    %c0_53 = arith.constant 0 : index
    %c0_54 = arith.constant 0 : index
    %132 = vector.load %arg4[%c0_52, %c0_53, %c0_54] : memref<1x8x64xf32, #tpu.memory_space<vmem>>, vector<1x8x64xf32>
    %133 = vector.shape_cast %132 : vector<1x8x64xf32> to vector<8x64xf32>
    %134 = vector.shape_cast %131 : vector<8x64xf32> to vector<1x8x64xf32>
    tpu.vector_store %arg4[%c0_52, %c0_53, %c0_54], %134 {strides = array<i32>} : memref<1x8x64xf32, #tpu.memory_space<vmem>>, vector<1x8x64xf32>,
    %c5_i32 = arith.constant 5 : i32
    %135 = arith.cmpi eq, %arg0, %c5_i32 : i32
    %136 = arith.extui %135 : i1 to i32
    %c0_i32_55 = arith.constant 0 : i32
    %137 = arith.cmpi ne, %136, %c0_i32_55 : i32
    scf.if %137 {
      %c0_56 = arith.constant 0 : index
      %c0_57 = arith.constant 0 : index
      %c0_58 = arith.constant 0 : index
      %138 = vector.load %arg6[%c0_56, %c0_57, %c0_58] : memref<4x8x32xf32, #tpu.memory_space<vmem>>, vector<4x8x32xf32>
      %c0_59 = arith.constant 0 : index
      %c0_60 = arith.constant 0 : index
      %c0_61 = arith.constant 0 : index
      %139 = vector.load %arg5[%c0_59, %c0_60, %c0_61] : memref<4x8x32xf32, #tpu.memory_space<vmem>>, vector<4x8x32xf32>
      tpu.vector_store %arg5[%c0_59, %c0_60, %c0_61], %138 {strides = array<i32>} : memref<4x8x32xf32, #tpu.memory_space<vmem>>, vector<4x8x32xf32>,
    } else {
    }
    return
  }
  func.func @transform_0(%arg0: i32) -> (i32, i32, i32) {
    %c0_i32 = arith.constant 0 : i32
    %c0_i32_0 = arith.constant 0 : i32
    %c0_i32_1 = arith.constant 0 : i32
    return %arg0, %c0_i32, %c0_i32_0 : i32, i32, i32
  }
  func.func @transform_1(%arg0: i32) -> (i32, i32, i32) {
    %c0_i32 = arith.constant 0 : i32
    %c0_i32_0 = arith.constant 0 : i32
    %c0_i32_1 = arith.constant 0 : i32
    %c0_i32_2 = arith.constant 0 : i32
    return %c0_i32, %c0_i32_0, %c0_i32_1 : i32, i32, i32
  }
  func.func @transform_2(%arg0: i32) -> (i32, i32) {
    %c0_i32 = arith.constant 0 : i32
    %c0_i32_0 = arith.constant 0 : i32
    %c0_i32_1 = arith.constant 0 : i32
    return %c0_i32, %c0_i32_0 : i32, i32
  }
  func.func @transform_3(%arg0: i32) -> (i32, i32, i32) {
    %c0_i32 = arith.constant 0 : i32
    %c0_i32_0 = arith.constant 0 : i32
    %c0_i32_1 = arith.constant 0 : i32
    return %arg0, %c0_i32, %c0_i32_0 : i32, i32, i32
  }
  func.func @transform_4(%arg0: i32) -> (i32, i32, i32) {
    %c0_i32 = arith.constant 0 : i32
    %c0_i32_0 = arith.constant 0 : i32
    %c0_i32_1 = arith.constant 0 : i32
    %c0_i32_2 = arith.constant 0 : i32
    return %c0_i32, %c0_i32_0, %c0_i32_1 : i32, i32, i32
  }
}

</mosaic_0001>

<bundles_post_ra>
// kernel: decoder_forward_seq.1
= control target key start
LH: loop header
LB: loop body
LE: loop exit
PB: predicated region body
PF: predicated region fallthrough
CT: control target
= control target key end

     0   :  { %10 = vsyncpa [#allocation4], 0  ;;  %s2109_s0 = inlined_call_operand.vmem [shape: s32[6,8,1], index: 0, kind: input, shape index: {}]   ;;  %s2110_s1 = inlined_call_operand.hbm [shape: f32[4,8,32], index: 1, kind: input, shape index: {}, may-alias: {1,4}]   ;;  %s2111_s2 = inlined_call_operand.hbm [shape: f32[408,128], index: 2, kind: input, shape index: {}]   ;;  %s2112_s3 = inlined_call_operand.hbm [shape: f32[6,8,64], index: 3, kind: output, shape index: {0}]   ;;  %s2113_s4 = inlined_call_operand.hbm [shape: f32[4,8,32], index: 4, kind: output, shape index: {1}, may-alias: {1,4}]  }
   0x1   :  { %11 = vsyncpa [#allocation7], 0 }
   0x2   :  { %12 = vsyncpa [#allocation5], 0 }
   0x3   :  { %14 = vsyncpa [#allocation5 + $0x1], 0 }
   0x4   :  { %15 = vsyncpa [#allocation10], 0  ;;  %s1820_s15 = smov 0   ;;  %s1822_s16 = smov 0  }
   0x5   :  { %s1824_s17 = smov 0   ;;  %s1826_s18 = smov 0  }
   0x6 LB: > { %s1841_s19 = sadd.s32 4294967295, %s1780_s18   ;;  %s1314_s20 = sadd.s32 4294967294, %s1780_s18   ;;  %s1780_s18 = sphi %s1826_s18, %s2133_s18   ;;  %s1776_s17 = sphi %s1824_s17, %s2132_s17   ;;  %s1772_s16 = sphi %s1822_s16, %s2131_s16   ;;  %s1768_s15 = sphi %s1820_s15, %s2130_s15  }
   0x7   : > { %s1845_s21 = sadd.s32 1, %s1780_s18   ;;  %s96_s22 = sadd.s32 1, %s1776_s17 }
   0x8   : > { %s93_s23 = ssub.s32 %s1780_s18, %s1845_s21  ;;  %p106_p0 = scmp.ne.s32.totalorder %s1776_s17, %s1772_s16 }
   0x9   : > { %p94_p1 = scmp.eq.s32.totalorder %s93_s23, 0  ;;  %p2114_p2 = scmp.eq.s32.totalorder %s1841_s19, 5 }
   0xa   : > { %p112_p3 = scmp.ne.s32.totalorder %s1772_s16, %s1768_s15  ;;  %p113_p4 = scmp.eq.s32.totalorder %s1314_s20, 5 }
   0xb   : > { %s1856_s24 = scalar_select %p94_p1, %s1776_s17, %s96_s22  }
   0xc   : > { %p1860_p5 = por %p2114_p2, %p106_p0  ;;  %p1864_p6 = por %p113_p4, %p112_p3 }
   0xd   : > { %p1315_p7 = scmp.ge.s32.totalorder %s1780_s18, 1  ;;  %p141_p8 = scmp.lt.s32.totalorder %s1780_s18, 7 }
   0xe   : > { %s2117_s26 = scalar_select %p1864_p6, 1, 0 }
   0xf   : > { %p2115_p10 = scmp.eq.s32.totalorder %s1841_s19, 0  ;;  %p1872_p11 = pnand %p1315_p7, %p141_p8 }
  0x10   : > { %s1782_s28 = smov [#allocation3]   ;;  %s1783_s5 = smov [#allocation6]  }
  0x11   : > { %s153_s29 = sshll.u32 %s1782_s28, 4  ;;  %p1545_p12 = pneg %p1872_p11  ;;  %s154_s29 = int_to_ptr.vmem [resolvable:$true] %s153_s29 }
  0x12   : > { %s166_s6 = sshll.u32 %s1783_s5, 4  ;;  %s1643_s7 = scalar_lea.vmem %s154_s29, 512  ;;  %s167_s6 = int_to_ptr.vmem [resolvable:$true] %s166_s6 }
  0x13   : > { %p1880_p13 = pnand %p2115_p10, %p1545_p12  ;;  %p1644_p1 = scmp.ne.s32.totalorder %s154_s29, %s1643_s7 }
  0x14   : > { %p1651_p7 = scmp.lt.s32.totalorder %s154_s29, %s154_s29  ;;  %p1652_p8 = scmp.lt.s32.totalorder %s1643_s7, %s1643_s7 }
  0x15   : > { %p1634_p0 = pneg %p1880_p13 }
  0x16   : > { %p1653_p2 = por %p1652_p8, %p1651_p7 }
  0x17   : > { %p1646_p3 = pnand %p1644_p1, %p1634_p0 }
  0x19   : > { %p1647_p4 = pneg %p1646_p3 }
  0x1b   : > { %p1654_p12 = pnand %p1653_p2, %p1647_p4 }
  0x1d   : > { %1657 = shalt.err (!%p1654_p12)
}
  0x1e   : > { %s1784_s8 = smov 128   ;;  %s1785_s9 = smov 8  }
  0x1f   : > { %1548 = dma.hbm_to_vmem [thread:$0]  (!%p1880_p13), %s2110_s1, 512, %s154_s29, [#allocation4], %s1784_s8, %s1784_s8, %s1785_s9  }
  0x20   : > { %s1669_s12 = scalar_lea.vmem %s167_s6, 6528  ;;  %p1677_p10 = scmp.lt.s32.totalorder %s167_s6, %s167_s6 }
  0x21   : > { %p1670_p9 = scmp.ne.s32.totalorder %s167_s6, %s1669_s12  ;;  %p1678_p6 = scmp.lt.s32.totalorder %s1669_s12, %s1669_s12 }
  0x23   : > { %p1672_p1 = pnand %p1670_p9, %p1634_p0  ;;  %p1679_p7 = por %p1678_p6, %p1677_p10 }
  0x25   : > { %p1673_p3 = pneg %p1672_p1 }
  0x27   : > { %p1680_p2 = pnand %p1679_p7, %p1673_p3 }
  0x29   : > { %1683 = shalt.err (!%p1680_p2)
}
  0x2a   : > { %1551 = dma.hbm_to_vmem [thread:$0]  (!%p1880_p13), %s2111_s2, 6528, %s167_s6, [#allocation7], %s1784_s8, %s1784_s8, %s1785_s9  }
  0x2b   : > { %189 = sbr.rel (%p1872_p11) target bundleno = 4076 (0xfec), region = 32  ;;  %p2120_p4 = scmp.eq.s32.totalorder (!%p1872_p11), %s1841_s19, 0 }
  0x30   : > { %1751 = dma.done.wait (%p2120_p4), [#allocation4], 512   ;;  %p2121_p9 = pmov %p2120_p4 }
  0x31   : > { %p2122_p0 = pmov %p2120_p4 }
  0x32   : > { %1753 = vsyncadd (%p2121_p9), [#allocation4], 4294966784 }
  0x33   : > { %1755 = dma.done.wait (%p2122_p0), [#allocation7], 6528   ;;  %p2123_p6 = pmov %p2122_p0 }
  0x34   : > { %s213_s20 = sand.u32 1, %s1772_s16   ;;  %p218_p10 = scmp.lt.s32.totalorder %s1841_s19, 5 }
  0x35   : > { %1757 = vsyncadd (%p2123_p6), [#allocation7], 4294960768  ;;  %s1916_s22 = sshll.u32 %s213_s20, 3  ;;  %p2124_p11 = scmp.ne.s32.totalorder %s1841_s19, 0 }
  0x36   : > { %s219_s23 = scalar_select %p218_p10, %s1841_s19, 5 }
  0x37   : > { %s215_s5 = scalar_lea.vmem [#allocation8], %s1916_s22  ;;  %225 = sbr.rel (%p2124_p11) target bundleno = 63 (0x3f), region = 44 }
  0x38   : > { %s1323_s27 = sshll.u32 %s219_s23, 3 }
  0x39   : > { %s221_s30 = scalar_lea.vmem %s2109_s0, %s1323_s27 }
  0x3c   : > { %v226_v0 = vld [vmem:[#allocation3] sm:$0xff]  ;;  %vm230_vm0 = vcmask 261120   ;;  %v227_v1 = vld [vmem:[#allocation3 + $0x8] sm:$0xff]  ;;  %v228_v2 = vld [vmem:[#allocation3 + $0x10] sm:$0xff] }
  0x3d   : > { %231 = vst.msk [vmem:[#allocation2] sm:$0xff] %vm230_vm0, %v226_v0  ;;  %232 = vst.msk [vmem:[#allocation2 + $0x8] sm:$0xff] %vm230_vm0, %v227_v1  ;;  %v229_v3 = vld [vmem:[#allocation3 + $0x18] sm:$0xff] }
  0x3e   : > { %233 = vst.msk [vmem:[#allocation2 + $0x10] sm:$0xff] %vm230_vm0, %v228_v2  ;;  %234 = vst.msk [vmem:[#allocation2 + $0x18] sm:$0xff] %vm230_vm0, %v229_v3 }
  0x3f PF: > { %v235_v4 = vld [vmem:[%s221_s30] sm:$0xff]  ;;  %v255_v5 = vld [vmem:[#allocation6 + $0x118] sm:$0xff]  ;;  %v1786_v6 = vmov 0   ;;  %v1787_v7 = vmov 0.0   ;;  %v254_v8 = vld [vmem:[#allocation6 + $0x110] sm:$0xff]  ;;  %vm261_vm4 = vcmask 261120   ;;  %v240_v21 = vlaneseq }
  0x40   : > { %1607 = vset.pattern.permute.xlu0 %v1786_v6  ;;  %vm236_vm1 = vcmp.ge.s32.totalorder %v235_v4, 0  ;;  %vm237_vm2 = vcmp.lt.s32.totalorder %v235_v4, 64  ;;  %1416 = vmatprep.subr.mxu1 %v1787_v7  ;;  %v260_v9 = vld [vmem:[#allocation6 + $0x18] sm:$0xff]  ;;  %v253_v11 = vld [vmem:[#allocation6 + $0x108] sm:$0xff]  ;;  %v259_v12 = vld [vmem:[#allocation6 + $0x10] sm:$0xff]  ;;  %vm1788_vm5 = vmmov 0  }
  0x41   : > { %vm238_vm3 = vmand %vm236_vm1, %vm237_vm2  ;;  %1417 = vmatpush3.msra.mxu1 %v255_v5  ;;  %1405 = vmatprep.subr.mxu0 %v1787_v7  ;;  %v252_v13 = vld [vmem:[#allocation6 + $0x100] sm:$0xff]  ;;  %v258_v14 = vld [vmem:[#allocation6 + $0x8] sm:$0xff]  ;;  %v241_v22 = vand.u32 127, %v240_v21  ;;  %vm335_vm6 = vcmask 523264   ;;  %s1789_s6 = smov 32   ;;  %s1790_s7 = smov 64  }
  0x42   : > { %v239_v10 = vsel %vm238_vm3, %v235_v4, 1  ;;  %1418 = vmatprep.subr.mxu1 %v1787_v7  ;;  %1406 = vmatpush3.msra.mxu0 %v260_v9  ;;  %v251_v15 = vld [vmem:[#allocation6 + $0xf8] sm:$0xff]  ;;  %v257_v16 = vld [vmem:[#allocation6] sm:$0xff]  ;;  %v250_v17 = vld [vmem:[#allocation6 + $0xf0] sm:$0xff]  ;;  %p1340_p13 = scmp.ne.s32.totalorder %s1841_s19, 5 }
  0x43   : > { %243 = vperm.xlu0 %1607, %v239_v10   ;;  %1419 = vmatpush3.msra.mxu1 %v254_v8  ;;  %v249_v19 = vld [vmem:[#allocation6 + $0xe8] sm:$0xff]  ;;  %v248_v20 = vld [vmem:[#allocation6 + $0xe0] sm:$0xff]  ;;  %v649_v24 = vld [vmem:[#allocation6 + $0x58] sm:$0xff] }
  0x44   : > { %1420 = vmatprep.subr.mxu1 %v1787_v7  ;;  %1407 = vmatprep.subr.mxu0 %v1787_v7  ;;  %v1934_v18 = vld [vmem:[#allocation2] sm:$0xff]  ;;  %v648_v26 = vld [vmem:[#allocation6 + $0x50] sm:$0xff]  ;;  %v647_v27 = vld [vmem:[#allocation6 + $0x48] sm:$0xff] }
  0x45   : > { %1421 = vmatpush3.msra.mxu1 %v253_v11  ;;  %1408 = vmatpush3.msra.mxu0 %v259_v12  ;;  %v646_v28 = vld [vmem:[#allocation6 + $0x40] sm:$0xff]  ;;  %v1955_v29 = vld [vmem:[#allocation2 + $0x10] sm:$0xff]  ;;  %v843_v30 = vld [vmem:[#allocation6 + $0x78] sm:$0xff] }
  0x46   : > { %1422 = vmatprep.subr.mxu1 %v1787_v7  ;;  %1409 = vmatprep.subr.mxu0 %v1787_v7  ;;  %v842_v31 = vld [vmem:[#allocation6 + $0x70] sm:$0xff]  ;;  %v841_v32 = vld [vmem:[#allocation6 + $0x68] sm:$0xff]  ;;  %v840_v33 = vld [vmem:[#allocation6 + $0x60] sm:$0xff] }
  0x47   : > { %1423 = vmatpush3.msra.mxu1 %v252_v13  ;;  %1410 = vmatpush3.msra.mxu0 %v258_v14  ;;  %v1965_v34 = vld [vmem:[#allocation2 + $0x18] sm:$0xff]  ;;  %v1039_v35 = vld [vmem:[#allocation6 + $0x190] sm:$0xff]  ;;  %v1038_v36 = vld [vmem:[#allocation6 + $0x188] sm:$0xff] }
  0x48   : > { %1424 = vmatprep.subr.mxu1 %v1787_v7  ;;  %1411 = vmatprep.subr.mxu0 %v1787_v7  ;;  %v1037_v37 = vld [vmem:[#allocation6 + $0x180] sm:$0xff]  ;;  %v1036_v38 = vld [vmem:[#allocation6 + $0x178] sm:$0xff]  ;;  %v1035_v39 = vld [vmem:[#allocation6 + $0x170] sm:$0xff] }
  0x49   : > { %1425 = vmatpush3.msra.mxu1 %v251_v15  ;;  %1412 = vmatpush3.msra.mxu0 %v257_v16  ;;  %v1034_v40 = vld [vmem:[#allocation6 + $0x168] sm:$0xff]  ;;  %v1033_v41 = vld [vmem:[#allocation6 + $0x160] sm:$0xff]  ;;  %v1032_v42 = vld [vmem:[#allocation6 + $0x158] sm:$0xff] }
  0x4a   : > { %1426 = vmatprep.subr.mxu1 %v1787_v7  ;;  %1413 = vmatprep.mubr.msk.f32.mxu0 %vm1788_vm5, %v1787_v7  ;;  %v455_v1 = vld [vmem:[#allocation6 + $0x38] sm:$0xff]  ;;  %v454_v2 = vld [vmem:[#allocation6 + $0x30] sm:$0xff]  ;;  %v453_v3 = vld [vmem:[#allocation6 + $0x28] sm:$0xff] }
  0x4b   : > { %1427 = vmatpush3.msra.mxu1 %v250_v17  ;;  %1414 = vmatmul.mubr.msk.f32.vlgmr.msra.gmra.mxu0 %vm261_vm4, %v1934_v18  ;;  %v452_v4 = vld [vmem:[#allocation6 + $0x20] sm:$0xff]  ;;  %v451_v5 = vld [vmem:[#allocation2 + $0x8] sm:$0xff]  ;;  %v449_v6 = vld [vmem:[#allocation6 + $0x98] sm:$0xff] }
  0x4c   : > { %1428 = vmatprep.subr.mxu1 %v1787_v7  ;;  %1432 = vmatprep.mubr.msk.f32.mxu1 %vm1788_vm5, %v1787_v7  ;;  %v448_v9 = vld [vmem:[#allocation6 + $0x90] sm:$0xff]  ;;  %v447_v11 = vld [vmem:[#allocation6 + $0x88] sm:$0xff]  ;;  %v446_v12 = vld [vmem:[#allocation6 + $0x80] sm:$0xff] }
  0x4d   : > { %1429 = vmatpush3.msra.mxu1 %v249_v19  ;;  %1435 = vmatprep.subr.mxu0 %v1787_v7  ;;  %v601_v19 = vld [vmem:[#allocation6 + $0x120] sm:$0xff] }
  0x4e   : > { %1430 = vmatprep.subr.mxu1 %v1787_v7  ;;  %1443 = vmatprep.mubr.msk.f32.mxu0 %vm1788_vm5, %v1787_v7 }
  0x4f   : > { %1431 = vmatpush3.msra.mxu1 %v248_v20  ;;  %1436 = vmatpush3.msra.mxu0 %v455_v1  ;;  %v835_v1 = vld [vmem:[#allocation6 + $0xc8] sm:$0xff] }
  0x50   : > { %1457 = vmatprep.subr.mxu1 %v1787_v7  ;;  %1437 = vmatprep.subr.mxu0 %v1787_v7 }
  0x51   : > { %1438 = vmatpush3.msra.mxu0 %v454_v2  ;;  %v834_v2 = vld [vmem:[#allocation6 + $0xc0] sm:$0xff] }
  0x52   : > { %1439 = vmatprep.subr.mxu0 %v1787_v7 }
  0x53   : > { %1440 = vmatpush3.msra.mxu0 %v453_v3 }
  0x54   : > { %1441 = vmatprep.subr.mxu0 %v1787_v7 }
  0x55   : > { %1442 = vmatpush3.msra.mxu0 %v452_v4 }
  0x56   : > { %1444 = vmatmul.mubr.msk.f32.vlgmr.msra.gmra.mxu0 %vm261_vm4, %v451_v5  ;;  %1446 = vmatprep.subr.mxu0 %v1787_v7 }
  0x57   : > { %1447 = vmatpush3.msra.mxu0 %v449_v6  ;;  %1454 = vmatprep.mubr.msk.f32.mxu0 %vm1788_vm5, %v1787_v7 }
  0x58   : > { %1448 = vmatprep.subr.mxu0 %v1787_v7 }
  0x59   : > { %1449 = vmatpush3.msra.mxu0 %v448_v9  ;;  %v989_v9 = vld [vmem:[#allocation6 + $0x130] sm:$0xff] }
  0x5a   : > { %1450 = vmatprep.subr.mxu0 %v1787_v7 }
  0x5b   : > { %1451 = vmatpush3.msra.mxu0 %v447_v11 }
  0x5c   : > { %1452 = vmatprep.subr.mxu0 %v1787_v7 }
  0x5d   : > { %1453 = vmatpush3.msra.mxu0 %v446_v12 }
  0x5e   : > { %1468 = vmatprep.subr.mxu0 %v1787_v7 }
  0xbe   : > { %v244_v23 = vpop.permute.xlu0 %243 }
  0xbf   : > { %vm245_vm7 = vcmp.eq.s32.totalorder %v241_v22, %v244_v23 }
  0xc0   : > { %v1325_v25 = vsel %vm245_vm7, 1.0, %v1787_v7 }
  0xc1   : > { %1433 = vmatmul.mubr.msk.f32.vlgmr.msra.gmra.mxu1 %vm335_vm6, %v1325_v25 }
  0xc2   : > { %1458 = vmatpush3.msra.mxu1 %v649_v24  ;;  %1465 = vmatprep.mubr.msk.f32.mxu1 %vm1788_vm5, %v1787_v7 }
  0xc3   : > { %1459 = vmatprep.subr.mxu1 %v1787_v7 }
  0xc4   : > { %1460 = vmatpush3.msra.mxu1 %v648_v26 }
  0xc5   : > { %1461 = vmatprep.subr.mxu1 %v1787_v7 }
  0xc6   : > { %1462 = vmatpush3.msra.mxu1 %v647_v27 }
  0xc7   : > { %1463 = vmatprep.subr.mxu1 %v1787_v7 }
  0xc8   : > { %1464 = vmatpush3.msra.mxu1 %v646_v28 }
  0xc9   : > { %1479 = vmatprep.subr.mxu1 %v1787_v7  ;;  %1466 = vmatmul.mubr.msk.f32.vlgmr.msra.gmra.mxu1 %vm261_vm4, %v1955_v29 }
  0xca   : > { %1480 = vmatpush3.msra.mxu1 %v843_v30  ;;  %1487 = vmatprep.mubr.msk.f32.mxu1 %vm1788_vm5, %v1787_v7 }
  0xcb   : > { %1481 = vmatprep.subr.mxu1 %v1787_v7 }
  0xcc   : > { %1482 = vmatpush3.msra.mxu1 %v842_v31 }
  0xcd   : > { %1483 = vmatprep.subr.mxu1 %v1787_v7 }
  0xce   : > { %1484 = vmatpush3.msra.mxu1 %v841_v32 }
  0xcf   : > { %1485 = vmatprep.subr.mxu1 %v1787_v7 }
  0xd0   : > { %1486 = vmatpush3.msra.mxu1 %v840_v33 }
  0xd1   : > { %1501 = vmatprep.subr.mxu1 %v1787_v7  ;;  %1488 = vmatmul.mubr.msk.f32.vlgmr.msra.gmra.mxu1 %vm261_vm4, %v1965_v34 }
  0xd2   : > { %1502 = vmatpush3.msra.mxu1 %v1039_v35  ;;  %1517 = vmatprep.mubr.msk.f32.mxu1 %vm1788_vm5, %v1787_v7 }
  0xd3   : > { %1503 = vmatprep.subr.mxu1 %v1787_v7 }
  0xd4   : > { %1504 = vmatpush3.msra.mxu1 %v1038_v36  ;;  %v643_v36 = vld [vmem:[#allocation6 + $0xb8] sm:$0xff] }
  0xd5   : > { %1505 = vmatprep.subr.mxu1 %v1787_v7 }
  0xd6   : > { %1506 = vmatpush3.msra.mxu1 %v1037_v37  ;;  %v642_v37 = vld [vmem:[#allocation6 + $0xb0] sm:$0xff] }
  0xd7   : > { %1507 = vmatprep.subr.mxu1 %v1787_v7 }
  0xd8   : > { %1508 = vmatpush3.msra.mxu1 %v1036_v38  ;;  %v641_v38 = vld [vmem:[#allocation6 + $0xa8] sm:$0xff] }
  0xd9   : > { %1509 = vmatprep.subr.mxu1 %v1787_v7 }
  0xda   : > { %1510 = vmatpush3.msra.mxu1 %v1035_v39  ;;  %v640_v39 = vld [vmem:[#allocation6 + $0xa0] sm:$0xff] }
  0xdb   : > { %1511 = vmatprep.subr.mxu1 %v1787_v7 }
  0xdc   : > { %1512 = vmatpush3.msra.mxu1 %v1034_v40 }
  0xdd   : > { %1513 = vmatprep.subr.mxu1 %v1787_v7 }
  0xde   : > { %1514 = vmatpush3.msra.mxu1 %v1033_v41 }
  0xdf   : > { %1515 = vmatprep.subr.mxu1 %v1787_v7 }
  0xe0   : > { %1516 = vmatpush3.msra.mxu1 %v1032_v42 }
  0xe1   : > { %1518 = vmatmul.mubr.msk.f32.vlgmr.msra.gmra.mxu1 %vm335_vm6, %v1325_v25 }
 0x10b   : > { %v331_v43 = vpop.f32.mrf.mxu0 }
 0x10d   : > { %v1415_v44 = vpop.f32.mrf.mxu0 }
 0x116   : > { %v525_v15 = vpop.f32.mrf.mxu0 }
 0x118   : > { %v1445_v16 = vpop.f32.mrf.mxu0 }
 0x181   : > { %v405_v45 = vpop.f32.mrf.mxu1 }
 0x182   : > { %v406_v46 = vadd.f32 %v405_v45, %v331_v43 }
 0x183   : > { %v1434_v47 = vpop.f32.mrf.mxu1 }
 0x184   : > { %416 = vrot.lane.b32.xlu0 %v406_v46, %s1789_s6  ;;  %v1328_v54 = vmul.f32 -1.442695, %v406_v46 }
 0x186   : > { %1608 = vpow2.f32 %v1328_v54 }
 0x189   : > { %v1982_v48 = vpop.f32.mrf.mxu1 }
 0x18b   : > { %v1467_v49 = vpop.f32.mrf.mxu1 }
 0x191   : > { %v1984_v50 = vpop.f32.mrf.mxu1 }
 0x193   : > { %v1489_v51 = vpop.f32.mrf.mxu1  ;;  %v1609_v55 = vpop.eup %1608 }
 0x194   : > { %v412_v56 = vadd.f32 1.0, %v1609_v55 }
 0x196   : > { %1610 = vrcp.f32 %v412_v56 }
 0x1a1   : > { %v1986_v52 = vpop.f32.mrf.mxu1 }
 0x1a3   : > { %v1519_v53 = vpop.f32.mrf.mxu1  ;;  %v1611_v57 = vpop.eup %1610 }
 0x1f6   : > { %v417_v58 = vpop.permute.xlu0 %416 }
 0x1f7   : > { %v419_v59 = vmul.f32 %v1611_v57, %v417_v58 }
 0x1f9   : > { %421 = vrot.lane.b32.xlu1 %v419_v59, %s1790_s7 }
 0x26b   : > { %v422_v60 = vpop.permute.xlu1 %421 }
 0x26c   : > { %v424_v61 = vadd.f32 %v422_v60, %v406_v46  ;;  %v795_v46 = vld [vmem:[#allocation6 + $0x128] sm:$0xff] }
 0x26e   : > { %1612 = vtanh.f32 %v424_v61 }
 0x27b   : > { %v1613_v62 = vpop.eup %1612 }
 0x27c   : > { %427 = vrot.lane.b32.xlu1 %v1613_v62, %s1790_s7 }
 0x2ee   : > { %v428_v63 = vpop.permute.xlu1 %427 }
 0x2ef   : > { %v430_v0 = vsub.f32 %v1934_v18, %v428_v63  ;;  %v837_v63 = vld [vmem:[#allocation6 + $0xd8] sm:$0xff] }
 0x2f1   : > { %432 = vrot.lane.b32.xlu0 %v430_v0, %s1789_s6  ;;  %v836_v0 = vld [vmem:[#allocation6 + $0xd0] sm:$0xff] }
 0x363   : > { %v433_v8 = vpop.permute.xlu0 %432 }
 0x364   : > { %v435_v10 = vmul.f32 %v1611_v57, %v433_v8 }
 0x366   : > { %437 = vrot.lane.b32.xlu1 %v435_v10, %s1789_s6 }
 0x3d8   : > { %v438_v13 = vpop.permute.xlu1 %437 }
 0x3d9   : > { %v440_v14 = vadd.f32 %v1613_v62, %v438_v13 }
 0x3db   : > { %442 = vrot.lane.b32.xlu0 %v440_v14, %s1790_s7 }
 0x44d   : > { %v443_v17 = vpop.permute.xlu0 %442 }
 0x44e   : > { %445 = vst.msk [vmem:[#allocation2] sm:$0xff] %vm261_vm4, %v443_v17  ;;  %1455 = vmatmul.mubr.msk.f32.vlgmr.msra.gmra.mxu0 %vm261_vm4, %v443_v17 }
 0x44f   : > { %1476 = vmatprep.mubr.msk.f32.mxu0 %vm1788_vm5, %v1787_v7  ;;  %1469 = vmatpush3.msra.mxu0 %v643_v36 }
 0x450   : > { %1470 = vmatprep.subr.mxu0 %v1787_v7 }
 0x451   : > { %1471 = vmatpush3.msra.mxu0 %v642_v37 }
 0x452   : > { %1472 = vmatprep.subr.mxu0 %v1787_v7 }
 0x453   : > { %1473 = vmatpush3.msra.mxu0 %v641_v38 }
 0x454   : > { %1474 = vmatprep.subr.mxu0 %v1787_v7 }
 0x455   : > { %1475 = vmatpush3.msra.mxu0 %v640_v39 }
 0x456   : > { %1490 = vmatprep.subr.mxu0 %v1787_v7 }
 0x50e   : > { %v597_v18 = vpop.f32.mrf.mxu0 }
 0x50f   : > { %v598_v20 = vadd.f32 %v597_v18, %v525_v15 }
 0x510   : > { %v1456_v21 = vpop.f32.mrf.mxu0 }
 0x511   : > { %v602_v22 = vadd.f32 %v601_v19, %v598_v20 }
 0x513   : > { %610 = vrot.lane.b32.xlu1 %v602_v22, %s1789_s6  ;;  %v1331_v23 = vmul.f32 -1.442695, %v602_v22 }
 0x515   : > { %1614 = vpow2.f32 %v1331_v23  ;;  %v1031_v23 = vld [vmem:[#allocation6 + $0x150] sm:$0xff] }
 0x522   : > { %v1615_v24 = vpop.eup %1614 }
 0x523   : > { %v606_v25 = vadd.f32 1.0, %v1615_v24  ;;  %v1030_v24 = vld [vmem:[#allocation6 + $0x148] sm:$0xff] }
 0x525   : > { %1616 = vrcp.f32 %v606_v25  ;;  %v1029_v25 = vld [vmem:[#allocation6 + $0x140] sm:$0xff] }
 0x532   : > { %v1617_v26 = vpop.eup %1616 }
 0x585   : > { %v611_v27 = vpop.permute.xlu1 %610 }
 0x586   : > { %v613_v28 = vmul.f32 %v1617_v26, %v611_v27 }
 0x588   : > { %615 = vrot.lane.b32.xlu0 %v613_v28, %s1790_s7 }
 0x5fa   : > { %v616_v30 = vpop.permute.xlu0 %615 }
 0x5fb   : > { %v618_v31 = vadd.f32 %v616_v30, %v602_v22 }
 0x5fd   : > { %1618 = vtanh.f32 %v618_v31 }
 0x60a   : > { %v1619_v32 = vpop.eup %1618 }
 0x60b   : > { %621 = vrot.lane.b32.xlu1 %v1619_v32, %s1790_s7 }
 0x67d   : > { %v622_v33 = vpop.permute.xlu1 %621 }
 0x67e   : > { %v624_v35 = vsub.f32 %v451_v5, %v622_v33 }
 0x680   : > { %626 = vrot.lane.b32.xlu0 %v624_v35, %s1789_s6 }
 0x6f2   : > { %v627_v40 = vpop.permute.xlu0 %626 }
 0x6f3   : > { %v629_v41 = vmul.f32 %v1617_v26, %v627_v40  ;;  %v1028_v26 = vld [vmem:[#allocation6 + $0x138] sm:$0xff] }
 0x6f5   : > { %631 = vrot.lane.b32.xlu1 %v629_v41, %s1789_s6 }
 0x767   : > { %v632_v42 = vpop.permute.xlu1 %631 }
 0x768   : > { %v634_v43 = vadd.f32 %v1619_v32, %v632_v42 }
 0x76a   : > { %636 = vrot.lane.b32.xlu0 %v634_v43, %s1790_s7 }
 0x7dc   : > { %v637_v44 = vpop.permute.xlu0 %636 }
 0x7dd   : > { %639 = vst.msk [vmem:[#allocation2 + $0x8] sm:$0xff] %vm261_vm4, %v637_v44  ;;  %1477 = vmatmul.mubr.msk.f32.vlgmr.msra.gmra.mxu0 %vm261_vm4, %v637_v44 }
 0x7de   : > { %1498 = vmatprep.mubr.msk.f32.mxu0 %vm1788_vm5, %v1787_v7  ;;  %1491 = vmatpush3.msra.mxu0 %v837_v63 }
 0x7df   : > { %1492 = vmatprep.subr.mxu0 %v1787_v7 }
 0x7e0   : > { %1493 = vmatpush3.msra.mxu0 %v836_v0 }
 0x7e1   : > { %1494 = vmatprep.subr.mxu0 %v1787_v7 }
 0x7e2   : > { %1495 = vmatpush3.msra.mxu0 %v835_v1 }
 0x7e3   : > { %1496 = vmatprep.subr.mxu0 %v1787_v7 }
 0x7e4   : > { %1497 = vmatpush3.msra.mxu0 %v834_v2 }
 0x7e5   : > { %1520 = vmatprep.subr.mxu0 %v1787_v7 }
 0x89d   : > { %v791_v45 = vpop.f32.mrf.mxu0 }
 0x89e   : > { %v792_v47 = vadd.f32 %v791_v45, %v1982_v48 }
 0x89f   : > { %v1478_v49 = vpop.f32.mrf.mxu0 }
 0x8a0   : > { %v796_v51 = vadd.f32 %v795_v46, %v792_v47 }
 0x8a2   : > { %804 = vrot.lane.b32.xlu1 %v796_v51, %s1789_s6  ;;  %v1334_v53 = vmul.f32 -1.442695, %v796_v51 }
 0x8a4   : > { %1620 = vpow2.f32 %v1334_v53 }
 0x8b1   : > { %v1621_v54 = vpop.eup %1620 }
 0x8b2   : > { %v800_v55 = vadd.f32 1.0, %v1621_v54 }
 0x8b4   : > { %1622 = vrcp.f32 %v800_v55 }
 0x8c1   : > { %v1623_v56 = vpop.eup %1622 }
 0x914   : > { %v805_v57 = vpop.permute.xlu1 %804 }
 0x915   : > { %v807_v58 = vmul.f32 %v1623_v56, %v805_v57 }
 0x917   : > { %809 = vrot.lane.b32.xlu0 %v807_v58, %s1790_s7 }
 0x989   : > { %v810_v59 = vpop.permute.xlu0 %809 }
 0x98a   : > { %v812_v60 = vadd.f32 %v810_v59, %v796_v51 }
 0x98c   : > { %1624 = vtanh.f32 %v812_v60 }
 0x999   : > { %v1625_v61 = vpop.eup %1624 }
 0x99a   : > { %815 = vrot.lane.b32.xlu1 %v1625_v61, %s1790_s7 }
 0xa0c   : > { %v816_v48 = vpop.permute.xlu1 %815 }
 0xa0d   : > { %v818_v62 = vsub.f32 %v1955_v29, %v816_v48 }
 0xa0f   : > { %820 = vrot.lane.b32.xlu0 %v818_v62, %s1789_s6 }
 0xa81   : > { %v821_v3 = vpop.permute.xlu0 %820 }
 0xa82   : > { %v823_v29 = vmul.f32 %v1623_v56, %v821_v3 }
 0xa84   : > { %825 = vrot.lane.b32.xlu1 %v823_v29, %s1789_s6 }
 0xaf6   : > { %v826_v4 = vpop.permute.xlu1 %825 }
 0xaf7   : > { %v828_v5 = vadd.f32 %v1625_v61, %v826_v4 }
 0xaf9   : > { %830 = vrot.lane.b32.xlu0 %v828_v5, %s1790_s7 }
 0xb6b   : > { %v831_v6 = vpop.permute.xlu0 %830 }
 0xb6c   : > { %833 = vst.msk [vmem:[#allocation2 + $0x10] sm:$0xff] %vm261_vm4, %v831_v6  ;;  %1499 = vmatmul.mubr.msk.f32.vlgmr.msra.gmra.mxu0 %vm261_vm4, %v831_v6 }
 0xb6d   : > { %1528 = vmatprep.mubr.msk.f32.mxu0 %vm1788_vm5, %v1787_v7  ;;  %1521 = vmatpush3.msra.mxu0 %v1031_v23 }
 0xb6e   : > { %1522 = vmatprep.subr.mxu0 %v1787_v7 }
 0xb6f   : > { %1523 = vmatpush3.msra.mxu0 %v1030_v24 }
 0xb70   : > { %1524 = vmatprep.subr.mxu0 %v1787_v7 }
 0xb71   : > { %1525 = vmatpush3.msra.mxu0 %v1029_v25 }
 0xb72   : > { %1526 = vmatprep.subr.mxu0 %v1787_v7 }
 0xb73   : > { %1527 = vmatpush3.msra.mxu0 %v1028_v26 }
 0xc2c   : > { %v985_v8 = vpop.f32.mrf.mxu0 }
 0xc2d   : > { %v986_v10 = vadd.f32 %v985_v8, %v1984_v50 }
 0xc2e   : > { %v1500_v11 = vpop.f32.mrf.mxu0 }
 0xc2f   : > { %v990_v12 = vadd.f32 %v989_v9, %v986_v10 }
 0xc31   : > { %998 = vrot.lane.b32.xlu1 %v990_v12, %s1789_s6  ;;  %v1337_v13 = vmul.f32 -1.442695, %v990_v12 }
 0xc33   : > { %1626 = vpow2.f32 %v1337_v13 }
 0xc40   : > { %v1627_v14 = vpop.eup %1626 }
 0xc41   : > { %v994_v15 = vadd.f32 1.0, %v1627_v14 }
 0xc43   : > { %1628 = vrcp.f32 %v994_v15 }
 0xc50   : > { %v1629_v16 = vpop.eup %1628 }
 0xca3   : > { %v999_v17 = vpop.permute.xlu1 %998 }
 0xca4   : > { %v1001_v18 = vmul.f32 %v1629_v16, %v999_v17 }
 0xca6   : > { %1003 = vrot.lane.b32.xlu0 %v1001_v18, %s1790_s7 }
 0xd18   : > { %v1004_v19 = vpop.permute.xlu0 %1003 }
 0xd19   : > { %v1006_v20 = vadd.f32 %v1004_v19, %v990_v12 }
 0xd1b   : > { %1630 = vtanh.f32 %v1006_v20 }
 0xd28   : > { %v1631_v21 = vpop.eup %1630 }
 0xd29   : > { %1009 = vrot.lane.b32.xlu1 %v1631_v21, %s1790_s7 }
 0xd9b   : > { %v1010_v50 = vpop.permute.xlu1 %1009 }
 0xd9c   : > { %v1012_v22 = vsub.f32 %v1965_v34, %v1010_v50 }
 0xd9e   : > { %1014 = vrot.lane.b32.xlu0 %v1012_v22, %s1789_s6 }
 0xe10   : > { %v1015_v27 = vpop.permute.xlu0 %1014 }
 0xe11   : > { %v1017_v28 = vmul.f32 %v1629_v16, %v1015_v27 }
 0xe13   : > { %1019 = vrot.lane.b32.xlu1 %v1017_v28, %s1789_s6 }
 0xe85   : > { %v1020_v34 = vpop.permute.xlu1 %1019 }
 0xe86   : > { %v1022_v30 = vadd.f32 %v1631_v21, %v1020_v34 }
 0xe88   : > { %1024 = vrot.lane.b32.xlu0 %v1022_v30, %s1790_s7 }
 0xefa   : > { %v1025_v31 = vpop.permute.xlu0 %1024 }
 0xefb   : > { %1027 = vst.msk [vmem:[#allocation2 + $0x18] sm:$0xff] %vm261_vm4, %v1025_v31  ;;  %1529 = vmatmul.mubr.msk.f32.vlgmr.msra.gmra.mxu0 %vm261_vm4, %v1025_v31 }
 0xfba   : > { %1186 = sbr.rel (%p1340_p13) target bundleno = 4034 (0xfc2), region = 48 }
 0xfbb   : > { %v1178_v32 = vpop.f32.mrf.mxu0 }
 0xfbc   : > { %v1179_v33 = vadd.f32 %v1178_v32, %v1986_v52 }
 0xfbd   : > { %v1530_v35 = vpop.f32.mrf.mxu0 }
 0xfbe   : > { %1182 = vst.msk [vmem:[%s215_s5] sm:$0xff] %vm335_vm6, %v1179_v33 }
 0xfbf   : > { %v1187_v7 = vld [vmem:[#allocation2] sm:$0xff]  ;;  %v1188_v36 = vld [vmem:[#allocation2 + $0x8] sm:$0xff]  ;;  %v1189_v37 = vld [vmem:[#allocation2 + $0x10] sm:$0xff] }
 0xfc0   : > { %1191 = vst.msk [vmem:[#allocation9] sm:$0xff] %vm261_vm4, %v1187_v7  ;;  %1192 = vst.msk [vmem:[#allocation9 + $0x8] sm:$0xff] %vm261_vm4, %v1188_v36  ;;  %v1190_v38 = vld [vmem:[#allocation2 + $0x18] sm:$0xff] }
 0xfc1   : > { %1193 = vst.msk [vmem:[#allocation9 + $0x10] sm:$0xff] %vm261_vm4, %v1189_v37  ;;  %1194 = vst.msk [vmem:[#allocation9 + $0x18] sm:$0xff] %vm261_vm4, %v1190_v38 }
 0xfc2 PF: > { %s1342_s8 = sshll.u32 %s1841_s19, 7  ;;  %s1209_s12 = sshll.u32 %s215_s5, 4  ;;  %s1210_s12 = int_to_ptr.vmem [resolvable:$true] %s1209_s12 }
 0xfc3   : > { %s1207_s11 = scalar_lea.hbm %s2112_s3, %s1342_s8  ;;  %s1196_s13 = scalar_lea.sflag [#allocation5], %s213_s20 }
 0xfc4   : > { %s1684_s14 = scalar_lea.vmem %s1210_s12, 128  ;;  %s1791_s23 = smov [#allocation8]  }
 0xfc5   : > { %p1685_p8 = scmp.ne.s32.totalorder %s1210_s12, %s1684_s14  ;;  %s1688_s27 = sshll.u32 %s1791_s23, 4  ;;  %s1689_s27 = int_to_ptr.vmem [resolvable:$false] %s1688_s27 }
 0xfc6   : > { %s1690_s28 = scalar_lea.vmem %s1689_s27, 256  ;;  %p1691_p3 = scmp.lt.s32.totalorder %s1210_s12, %s1689_s27 }
 0xfc7   : > { %p1686_p12 = pnand %p1685_p8, %p1860_p5  ;;  %p1692_p7 = scmp.lt.s32.totalorder %s1690_s28, %s1684_s14 }
 0xfc9   : > { %p1687_p1 = pneg %p1686_p12  ;;  %p1693_p2 = por %p1692_p7, %p1691_p3 }
 0xfcb   : > { %p1694_p4 = pnand %p1693_p2, %p1687_p1 }
 0xfcd   : > { %1697 = shalt.err (!%p1694_p4)
}
 0xfce   : > { %s1698_s29 = scalar_lea.hbm %s1207_s11, 128  ;;  %s1702_s30 = scalar_lea.hbm %s2112_s3, 768 }
 0xfcf   : > { %p1699_p9 = scmp.ne.s32.totalorder %s1207_s11, %s1698_s29  ;;  %p1703_p10 = scmp.lt.s32.totalorder %s1207_s11, %s2112_s3 }
 0xfd0   : > { %p1704_p11 = scmp.lt.s32.totalorder %s1702_s30, %s1698_s29 }
 0xfd1   : > { %p1700_p0 = pnand %p1699_p9, %p1860_p5 }
 0xfd2   : > { %p1705_p13 = por %p1704_p11, %p1703_p10 }
 0xfd3   : > { %p1701_p6 = pneg %p1700_p0 }
 0xfd5   : > { %p1706_p8 = pnand %p1705_p13, %p1701_p6 }
 0xfd7   : > { %1709 = shalt.err (!%p1706_p8)
}
 0xfd8   : > { %1539 = dma.vmem_to_hbm [thread:$0]  (%p1860_p5), %s1210_s12, 128, %s1207_s11, %s1196_s13  }
 0xfd9   : > { %s1792_s7 = smov [#allocation9]   ;;  %p2125_p1 = scmp.eq.s32.totalorder %s1841_s19, 5 }
 0xfda   : > { %s1219_s8 = sshll.u32 %s1792_s7, 4  ;;  %s1220_s8 = int_to_ptr.vmem [resolvable:$true] %s1219_s8 }
 0xfdb   : > { %s1710_s9 = scalar_lea.vmem %s1220_s8, 512  ;;  %p1717_p2 = scmp.lt.s32.totalorder %s1220_s8, %s1220_s8 }
 0xfdc   : > { %p1711_p12 = scmp.ne.s32.totalorder %s1220_s8, %s1710_s9  ;;  %p1718_p4 = scmp.lt.s32.totalorder %s1710_s9, %s1710_s9 }
 0xfde   : > { %p1712_p3 = pnand %p1711_p12, %p2125_p1  ;;  %p1719_p9 = por %p1718_p4, %p1717_p2 }
 0xfe0   : > { %p1713_p7 = pneg %p1712_p3 }
 0xfe2   : > { %p1720_p0 = pnand %p1719_p9, %p1713_p7 }
 0xfe4   : > { %1723 = shalt.err (!%p1720_p0)
}
 0xfe5   : > { %s1793_s10 = smov 128   ;;  %s1794_s14 = smov 8  }
 0xfe6   : > { %p2126_p6 = pmov %p2125_p1  ;;  %p2127_p5 = pmov %p2125_p1 }
 0xfe8   : > { %1541 = dma.vmem_to_hbm [thread:$0]  (%p2126_p6), %s1220_s8, 512, %s2113_s4, [#allocation10], %s1793_s10, %s1793_s10, %s1794_s14  }
 0xfe9   : > { %1759 = dma.done.wait (%p2127_p5), [#allocation10], 512   ;;  %p2128_p10 = pmov %p2125_p1 }
 0xfeb   : > { %1761 = vsyncadd (%p2128_p10), [#allocation10], 4294966784 }
 0xfec PF: > { %p1562_p11 = scmp.ge.s32.totalorder %s1780_s18, 2  ;;  %s1238_s12 = sand.u32 1, %s1768_s15  }
 0xfed   : > { %p2129_p13 = scmp.ne.s32.totalorder %s2117_s26, 0  ;;  %s1239_s13 = scalar_lea.sflag [#allocation5], %s1238_s12 }
 0xfef   : > { %p1553_p8 = pnand %p1562_p11, %p2129_p13 }
 0xff1   : > { %p1554_p12 = pneg %p1553_p8 }
 0xff3   : > { %1763 = dma.done.wait (%p1554_p12), %s1239_s13, 128  }
 0xff4   : > { %1765 = vsyncadd (%p1554_p12), %s1239_s13, 4294967168  ;;  %p18_p1 = scmp.ge.s32.totalorder %s1845_s21, 8   ;;  %s2130_s15 = smov %s1772_s16 }
 0xff5   : > { %s2131_s16 = smov %s1776_s17  ;;  %s2132_s17 = smov %s1856_s24 }
 0xff6   : > { %s2133_s18 = smov %s1845_s21  ;;  %20 = sbr.rel (!%p18_p1) target bundleno = 6 (0x6), region = 95 }
 0xffb   :  { %1244 = vsyncpa [#allocation4], 1 }
 0xffc   :  { %1246 = vsyncpa [#allocation4 + $0x1], 1 }
 0xffd   :  { %1247 = vsyncpa [#allocation7], 1 }
 0xffe   :  { %1248 = vsyncpa [#allocation5], 1 }
 0xfff   :  { %1250 = vsyncpa [#allocation5 + $0x1], 1 }
0x1000   :  { %1251 = vsyncpa [#allocation10], 1 }

</bundles_post_ra>
